<compile_context>
chip_gen: v7x
topology: tpu7x:2x2x1
jax: 0.10.0
libtpu: 0.0.40
codegen_flags: <defaults>
</compile_context>

<pallas_src>
import jax
import jax.numpy as jnp
from jax.experimental import pallas as pl
from jax.experimental.pallas import tpu as pltpu

HIDDEN = 64          # logical hidden size (matches nn.Linear(input_dim, 64))
HIDDEN_P = 128       # hidden padded to one full 128-lane vreg / MXU tile
LANE = 128
_VMEM_BUDGET = 32 * 1024 * 1024   # conservative tile budget (fits v7x scoped VMEM)


def _round_up(x, m):
    return ((x + m - 1) // m) * m


def mlp_kernel(x_ref, w1_ref, b1_ref, w2_ref, b2_ref, o_ref):
    # fc1: (tb, D_in) @ (D_in, 128); bias add + ReLU fused on the f32 accumulator.
    h = jnp.dot(x_ref[...], w1_ref[...], preferred_element_type=jnp.float32)
    h = jnp.maximum(h + b1_ref[...], 0.0)
    if h.dtype != w2_ref.dtype:        # avoid a pointless cast in the f32 path
        h = h.astype(w2_ref.dtype)
    # fc2: (tb, 128) @ (128, D_out_p)  -> lane-dense output store.
    y = jnp.dot(h, w2_ref[...], preferred_element_type=jnp.float32)
    o_ref[...] = (y + b2_ref[...]).astype(o_ref.dtype)


def _choose_tb(B, d_in, d_out_p, in_itemsize, out_itemsize):
    """Largest batch tile whose double-buffered traffic fits the VMEM budget."""
    resident = (d_in * HIDDEN_P + HIDDEN_P * d_out_p + HIDDEN_P + d_out_p) * 4
    per_row = (2 * d_in * in_itemsize          # x tile, double-buffered
               + 2 * d_out_p * out_itemsize    # out tile, double-buffered
               + HIDDEN_P * 4)                 # f32 hidden intermediate
    cap = max(8, (_VMEM_BUDGET - resident) // per_row)
    tb = 8
    for cand in (1024, 512, 256, 128, 64, 32, 16, 8):
        if cand <= cap:
            tb = cand
            break
    # never make the tile larger than the (8-rounded) batch itself
    return min(tb, _round_up(B, 8))


def mlp_forward(x, w1, b1, w2, b2, *, tb=None):
    B, D_in = x.shape
    assert w1.shape == (D_in, HIDDEN)
    D_out = w2.shape[1]
    D_out_p = _round_up(D_out, LANE)

    # Zero-pad hidden (64 -> 128) and output columns (D_out -> multiple of 128).
    # Padding with exact zeros keeps the math identical; padded hidden units
    # produce ReLU(0) = 0 and feed zero W2 rows, padded output cols are sliced.
    w1_p = jnp.pad(w1, ((0, 0), (0, HIDDEN_P - HIDDEN)))
    b1_p = jnp.pad(b1.reshape(1, HIDDEN), ((0, 0), (0, HIDDEN_P - HIDDEN)))
    w2_p = jnp.pad(w2, ((0, HIDDEN_P - HIDDEN), (0, D_out_p - D_out)))
    b2_p = jnp.pad(b2.reshape(1, D_out), ((0, 0), (0, D_out_p - D_out)))

    if tb is None:
        tb = _choose_tb(B, D_in, D_out_p, x.dtype.itemsize, x.dtype.itemsize)
    B_p = _round_up(B, tb)
    x_p = jnp.pad(x, ((0, B_p - B), (0, 0))) if B_p != B else x

    grid = (B_p // tb,)
    out = pl.pallas_call(
        mlp_kernel,
        out_shape=jax.ShapeDtypeStruct((B_p, D_out_p), x.dtype),
        grid_spec=pltpu.PrefetchScalarGridSpec(
            num_scalar_prefetch=0,
            grid=grid,
            in_specs=[
                pl.BlockSpec((tb, D_in), lambda i: (i, 0)),        # x tile
                pl.BlockSpec((D_in, HIDDEN_P), lambda i: (0, 0)),  # W1 (resident)
                pl.BlockSpec((1, HIDDEN_P), lambda i: (0, 0)),     # b1
                pl.BlockSpec((HIDDEN_P, D_out_p), lambda i: (0, 0)),  # W2 (resident)
                pl.BlockSpec((1, D_out_p), lambda i: (0, 0)),      # b2
            ],
            out_specs=pl.BlockSpec((tb, D_out_p), lambda i: (i, 0)),
        ),
        compiler_params=pltpu.CompilerParams(
            dimension_semantics=("parallel",),
            vmem_limit_bytes=64 * 1024 * 1024,
        ),
    )(x_p, w1_p, b1_p, w2_p, b2_p)

    # TODO(synk): for very large D_in (>= 4096) add a K-reduction grid axis with
    # a VMEM hidden accumulator instead of keeping the full (tb, D_in) x tile.
    return out[:B, :D_out]


def init_params(key, input_dim, output_dim, dtype=jnp.float32):
    # Deterministic init mimicking PyTorch nn.Linear default:
    # U(-1/sqrt(fan_in), 1/sqrt(fan_in)) for both weight and bias.
    k1, k2, k3, k4 = jax.random.split(key, 4)
    lim1 = 1.0 / jnp.sqrt(jnp.float32(input_dim))
    lim2 = 1.0 / jnp.sqrt(jnp.float32(HIDDEN))
    # stored as (in, out) -- transposed relative to PyTorch's (out, in)
    w1 = jax.random.uniform(k1, (input_dim, HIDDEN), dtype, -lim1, lim1)
    b1 = jax.random.uniform(k2, (1, HIDDEN), dtype, -lim1, lim1)
    w2 = jax.random.uniform(k3, (HIDDEN, output_dim), dtype, -lim2, lim2)
    b2 = jax.random.uniform(k4, (1, output_dim), dtype, -lim2, lim2)
    return w1, b1, w2, b2


if __name__ == "__main__":
    key = jax.random.PRNGKey(0)

    # Small shapes implied by the module (batch=8, input_dim=32, output_dim=16).
    batch, input_dim, output_dim = 8, 32, 16
    kx, kp, kx2 = jax.random.split(key, 3)
    x = jax.random.normal(kx, (batch, input_dim), jnp.float32)
    w1, b1, w2, b2 = init_params(kp, input_dim, output_dim)

    out = mlp_forward(x, w1, b1, w2, b2)
    jax.block_until_ready(out)

    ref = jnp.maximum(x @ w1 + b1, 0.0) @ w2 + b2
    assert out.shape == (batch, output_dim)
    assert jnp.allclose(out, ref, atol=1e-5, rtol=1e-5)

    # Larger, ragged-batch check: exercises multi-step 'parallel' grid,
    # batch padding, and the VMEM-budgeted tile selection.
    B2, D2_in, D2_out = 2000, 256, 16
    x2 = jax.random.normal(kx2, (B2, D2_in), jnp.float32)
    w1b, b1b, w2b, b2b = init_params(jax.random.PRNGKey(1), D2_in, D2_out)
    out2 = mlp_forward(x2, w1b, b1b, w2b, b2b)
    jax.block_until_ready(out2)

    h_ref = jnp.maximum(
        jnp.dot(x2, w1b, precision=jax.lax.Precision.HIGHEST) + b1b, 0.0)
    ref2 = jnp.dot(h_ref, w2b, precision=jax.lax.Precision.HIGHEST) + b2b
    assert out2.shape == (B2, D2_out)
    assert jnp.allclose(out2, ref2, atol=2e-2, rtol=2e-2)

    print("KERNEL_OK")
</pallas_src>

<mosaic_0001>
module attributes {stable_mosaic.version = 11 : i64} {
  func.func @mlp_kernel(%arg0: i32, %arg1: memref<8x32xf32, #tpu.memory_space<vmem>>, %arg2: memref<32x128xf32, #tpu.memory_space<vmem>>, %arg3: memref<1x128xf32, #tpu.memory_space<vmem>>, %arg4: memref<128x128xf32, #tpu.memory_space<vmem>>, %arg5: memref<1x128xf32, #tpu.memory_space<vmem>>, %arg6: memref<8x128xf32, #tpu.memory_space<vmem>>) attributes {dimension_semantics = [#tpu.dimension_semantics<parallel>], iteration_bounds = array<i64: 1>, scalar_prefetch = 0 : i64, scratch_operands = 0 : i64, tpu.core_type = #tpu.core_type<tc>, window_params = [{transform_indices = @transform_0, window_bounds = array<i64: 8, 32>}, {pipeline_mode = #tpu.pipeline_mode<synchronous>, transform_indices = @transform_1, window_bounds = array<i64: 32, 128>}, {pipeline_mode = #tpu.pipeline_mode<synchronous>, transform_indices = @transform_2, window_bounds = array<i64: 1, 128>}, {pipeline_mode = #tpu.pipeline_mode<synchronous>, transform_indices = @transform_3, window_bounds = array<i64: 128, 128>}, {pipeline_mode = #tpu.pipeline_mode<synchronous>, transform_indices = @transform_4, window_bounds = array<i64: 1, 128>}, {transform_indices = @transform_5, window_bounds = array<i64: 8, 128>}]} {
    %c0 = arith.constant 0 : index
    %c0_0 = arith.constant 0 : index
    %0 = vector.load %arg1[%c0, %c0_0] : memref<8x32xf32, #tpu.memory_space<vmem>>, vector<8x32xf32>
    %c0_1 = arith.constant 0 : index
    %c0_2 = arith.constant 0 : index
    %1 = vector.load %arg2[%c0_1, %c0_2] : memref<32x128xf32, #tpu.memory_space<vmem>>, vector<32x128xf32>
    %cst = arith.constant dense<0.000000e+00> : vector<8x128xf32>
    %2 = tpu.matmul %0, %1, %cst {dimension_numbers = #tpu.dot_dimension_numbers<[1], [0], [0], [1], [0, 0, 1, 1], [], []>} : vector<8x32xf32>, vector<32x128xf32>, vector<8x128xf32> -> vector<8x128xf32>
    %c0_3 = arith.constant 0 : index
    %c0_4 = arith.constant 0 : index
    %3 = vector.load %arg3[%c0_3, %c0_4] : memref<1x128xf32, #tpu.memory_space<vmem>>, vector<1x128xf32>
    %4 = vector.broadcast %3 : vector<1x128xf32> to vector<8x128xf32>
    %5 = arith.addf %2, %4 : vector<8x128xf32>
    %cst_5 = arith.constant 0.000000e+00 : f32
    %6 = vector.broadcast %cst_5 : f32 to vector<8x128xf32>
    %7 = arith.maximumf %5, %6 : vector<8x128xf32>
    %c0_6 = arith.constant 0 : index
    %c0_7 = arith.constant 0 : index
    %8 = vector.load %arg4[%c0_6, %c0_7] : memref<128x128xf32, #tpu.memory_space<vmem>>, vector<128x128xf32>
    %cst_8 = arith.constant dense<0.000000e+00> : vector<8x128xf32>
    %9 = tpu.matmul %7, %8, %cst_8 {dimension_numbers = #tpu.dot_dimension_numbers<[1], [0], [0], [1], [0, 0, 1, 1], [], []>} : vector<8x128xf32>, vector<128x128xf32>, vector<8x128xf32> -> vector<8x128xf32>
    %c0_9 = arith.constant 0 : index
    %c0_10 = arith.constant 0 : index
    %10 = vector.load %arg5[%c0_9, %c0_10] : memref<1x128xf32, #tpu.memory_space<vmem>>, vector<1x128xf32>
    %11 = vector.broadcast %10 : vector<1x128xf32> to vector<8x128xf32>
    %12 = arith.addf %9, %11 : vector<8x128xf32>
    %c0_11 = arith.constant 0 : index
    %c0_12 = arith.constant 0 : index
    %13 = vector.load %arg6[%c0_11, %c0_12] : memref<8x128xf32, #tpu.memory_space<vmem>>, vector<8x128xf32>
    tpu.vector_store %arg6[%c0_11, %c0_12], %12 {strides = array<i32>} : memref<8x128xf32, #tpu.memory_space<vmem>>, vector<8x128xf32>,
    return
  }
  func.func @transform_0(%arg0: i32) -> (i32, i32) {
    %c0_i32 = arith.constant 0 : i32
    %c0_i32_0 = arith.constant 0 : i32
    return %arg0, %c0_i32 : i32, i32
  }
  func.func @transform_1(%arg0: i32) -> (i32, i32) {
    %c0_i32 = arith.constant 0 : i32
    %c0_i32_0 = arith.constant 0 : i32
    %c0_i32_1 = arith.constant 0 : i32
    return %c0_i32, %c0_i32_0 : i32, i32
  }
  func.func @transform_2(%arg0: i32) -> (i32, i32) {
    %c0_i32 = arith.constant 0 : i32
    %c0_i32_0 = arith.constant 0 : i32
    %c0_i32_1 = arith.constant 0 : i32
    return %c0_i32, %c0_i32_0 : i32, i32
  }
  func.func @transform_3(%arg0: i32) -> (i32, i32) {
    %c0_i32 = arith.constant 0 : i32
    %c0_i32_0 = arith.constant 0 : i32
    %c0_i32_1 = arith.constant 0 : i32
    return %c0_i32, %c0_i32_0 : i32, i32
  }
  func.func @transform_4(%arg0: i32) -> (i32, i32) {
    %c0_i32 = arith.constant 0 : i32
    %c0_i32_0 = arith.constant 0 : i32
    %c0_i32_1 = arith.constant 0 : i32
    return %c0_i32, %c0_i32_0 : i32, i32
  }
  func.func @transform_5(%arg0: i32) -> (i32, i32) {
    %c0_i32 = arith.constant 0 : i32
    %c0_i32_0 = arith.constant 0 : i32
    return %arg0, %c0_i32 : i32, i32
  }
}

</mosaic_0001>

<bundles_post_ra>
// kernel: tpu_custom_call.1
= control target key start
LH: loop header
LB: loop body
LE: loop exit
PB: predicated region body
PF: predicated region fallthrough
CT: control target
= control target key end

     0   :  { %10 = vsyncpa [#allocation3], 0  ;;  %s646_s0 = inlined_call_operand.hbm [shape: f32[8,32], index: 0, kind: input, shape index: {}]   ;;  %s647_s1 = inlined_call_operand.hbm [shape: f32[32,128], index: 1, kind: input, shape index: {}]   ;;  %s648_s2 = inlined_call_operand.hbm [shape: f32[1,128], index: 2, kind: input, shape index: {}]   ;;  %s649_s3 = inlined_call_operand.hbm [shape: f32[128,128], index: 3, kind: input, shape index: {}]   ;;  %s650_s4 = inlined_call_operand.hbm [shape: f32[1,128], index: 4, kind: input, shape index: {}]   ;;  %s651_s5 = inlined_call_operand.hbm [shape: f32[8,128], index: 5, kind: output, shape index: {}]  }
   0x1   :  { %11 = vsyncpa [#allocation6], 0 }
   0x2   :  { %12 = vsyncpa [#allocation9], 0 }
   0x3   :  { %13 = vsyncpa [#allocation4], 0  ;;  %s533_s18 = smov [#allocation5]   ;;  %s393_s22 = scalar_lea.hbm %s647_s1, 512 }
   0x4   :  { %s29_s19 = sshll.u32 %s533_s18, 4  ;;  %p394_p0 = scmp.ne.s32.totalorder %s647_s1, %s393_s22  ;;  %s30_s19 = int_to_ptr.vmem [resolvable:$true] %s29_s19 }
   0x5   :  { %p397_p1 = scmp.lt.u32.totalorder %s393_s22, %s647_s1 }
   0x7   :  { %p399_p2 = pnand %p397_p1, %p394_p0 }
   0x9   :  { %402 = shalt.err (!%p399_p2)
}
   0xa   :  { %s403_s27 = scalar_lea.vmem %s30_s19, 512  ;;  %p408_p4 = scmp.lt.s32.totalorder %s30_s19, %s30_s19 }
   0xb   :  { %p404_p3 = scmp.ne.s32.totalorder %s30_s19, %s403_s27  ;;  %p409_p5 = scmp.lt.s32.totalorder %s403_s27, %s403_s27 }
   0xd   :  { %p410_p6 = por %p409_p5, %p408_p4 }
   0xf   :  { %p411_p7 = pnand %p410_p6, %p404_p3 }
  0x11   :  { %414 = shalt.err (!%p411_p7)
}
  0x12   :  { %s534_s28 = smov 128   ;;  %s535_s29 = smov 8  }
  0x13   :  { %35 = dma.hbm_to_vmem [thread:$0]  %s647_s1, 512, %s30_s19, [#allocation6], %s534_s28, %s534_s28, %s535_s29  }
  0x14   :  { %s536_s7 = smov [#allocation8]   ;;  %s537_s9 = smov [#allocation2]  }
  0x15   :  { %s51_s8 = sshll.u32 %s536_s7, 4  ;;  %s20_s10 = sshll.u32 %s537_s9, 4  ;;  %s52_s8 = int_to_ptr.vmem [resolvable:$true] %s51_s8  ;;  %s21_s10 = int_to_ptr.vmem [resolvable:$true] %s20_s10 }
  0x16   :  { %s415_s13 = scalar_lea.hbm %s649_s3, 2048 }
  0x17   :  { %p416_p8 = scmp.ne.s32.totalorder %s649_s3, %s415_s13  ;;  %p419_p9 = scmp.lt.u32.totalorder %s415_s13, %s649_s3 }
  0x19   :  { %p421_p10 = pnand %p419_p9, %p416_p8 }
  0x1b   :  { %424 = shalt.err (!%p421_p10)
}
  0x1c   :  { %s425_s1 = scalar_lea.vmem %s52_s8, 2048  ;;  %p430_p12 = scmp.lt.s32.totalorder %s52_s8, %s52_s8 }
  0x1d   :  { %p426_p11 = scmp.ne.s32.totalorder %s52_s8, %s425_s1  ;;  %p431_p13 = scmp.lt.s32.totalorder %s425_s1, %s425_s1 }
  0x1f   :  { %p432_p0 = por %p431_p13, %p430_p12 }
  0x21   :  { %p433_p1 = pnand %p432_p0, %p426_p11 }
  0x23   :  { %436 = shalt.err (!%p433_p1)
}
  0x24   :  { %57 = dma.hbm_to_vmem [thread:$0]  %s649_s3, 2048, %s52_s8, [#allocation9], %s534_s28, %s534_s28, %s535_s29  }
  0x25   :  { %s437_s22 = scalar_lea.hbm %s646_s0, 128 }
  0x26   :  { %p438_p2 = scmp.ne.s32.totalorder %s646_s0, %s437_s22  ;;  %p441_p3 = scmp.lt.u32.totalorder %s437_s22, %s646_s0 }
  0x28   :  { %p443_p4 = pnand %p441_p3, %p438_p2 }
  0x2a   :  { %446 = shalt.err (!%p443_p4)
}
  0x2b   :  { %s447_s27 = scalar_lea.vmem %s21_s10, 128  ;;  %p452_p6 = scmp.lt.s32.totalorder %s21_s10, %s21_s10 }
  0x2c   :  { %p448_p5 = scmp.ne.s32.totalorder %s21_s10, %s447_s27  ;;  %p453_p7 = scmp.lt.s32.totalorder %s447_s27, %s447_s27 }
  0x2e   :  { %p454_p8 = por %p453_p7, %p452_p6 }
  0x30   :  { %p455_p9 = pnand %p454_p8, %p448_p5 }
  0x32   :  { %458 = shalt.err (!%p455_p9)
}
  0x33   :  { %23 = dma.hbm_to_vmem [thread:$0]  %s646_s0, 128, %s21_s10, [#allocation3]  }
  0x34   :  { %s538_s29 = smov [#allocation7]   ;;  %s539_s6 = smov [#allocation10]  }
  0x35   :  { %s42_s30 = sshll.u32 %s538_s29, 4  ;;  %s64_s7 = sshll.u32 %s539_s6, 4  ;;  %s43_s30 = int_to_ptr.vmem [resolvable:$true] %s42_s30  ;;  %s65_s7 = int_to_ptr.vmem [resolvable:$true] %s64_s7 }
  0x36   :  { %s459_s11 = scalar_lea.hbm %s648_s2, 16 }
  0x37   :  { %p460_p10 = scmp.ne.s32.totalorder %s648_s2, %s459_s11  ;;  %p463_p11 = scmp.lt.u32.totalorder %s459_s11, %s648_s2 }
  0x39   :  { %p465_p12 = pnand %p463_p11, %p460_p10 }
  0x3b   :  { %468 = shalt.err (!%p465_p12)
}
  0x3c   :  { %s469_s0 = scalar_lea.vmem %s43_s30, 16  ;;  %s473_s10 = scalar_lea.vmem %s43_s30, 32 }
  0x3d   :  { %p470_p13 = scmp.ne.s32.totalorder %s43_s30, %s469_s0  ;;  %p474_p0 = scmp.lt.s32.totalorder %s43_s30, %s43_s30 }
  0x3e   :  { %p475_p1 = scmp.lt.s32.totalorder %s473_s10, %s469_s0 }
  0x40   :  { %p476_p2 = por %p475_p1, %p474_p0 }
  0x42   :  { %p477_p3 = pnand %p476_p2, %p470_p13 }
  0x44   :  { %480 = shalt.err (!%p477_p3)
}
  0x45   :  { %45 = dma.hbm_to_vmem [thread:$0]  %s648_s2, 16, %s43_s30, [#allocation6]  }
  0x46   :  { %s481_s19 = scalar_lea.hbm %s650_s4, 16 }
  0x47   :  { %p482_p4 = scmp.ne.s32.totalorder %s650_s4, %s481_s19  ;;  %p485_p5 = scmp.lt.u32.totalorder %s481_s19, %s650_s4 }
  0x49   :  { %p487_p6 = pnand %p485_p5, %p482_p4 }
  0x4b   :  { %490 = shalt.err (!%p487_p6)
}
  0x4c   :  { %s491_s24 = scalar_lea.vmem %s65_s7, 16  ;;  %s495_s25 = scalar_lea.vmem %s65_s7, 32 }
  0x4d   :  { %p492_p7 = scmp.ne.s32.totalorder %s65_s7, %s491_s24  ;;  %p496_p8 = scmp.lt.s32.totalorder %s65_s7, %s65_s7 }
  0x4e   :  { %p497_p9 = scmp.lt.s32.totalorder %s495_s25, %s491_s24 }
  0x50   :  { %p498_p10 = por %p497_p9, %p496_p8 }
  0x52   :  { %p499_p11 = pnand %p498_p10, %p492_p7 }
  0x54   :  { %502 = shalt.err (!%p499_p11)
}
  0x55   :  { %67 = dma.hbm_to_vmem [thread:$0]  %s650_s4, 16, %s65_s7, [#allocation9]  }
  0x56   :  { %525 = dma.done.wait [#allocation3], 128  }
  0x57   :  { %526 = vsyncadd [#allocation3], 4294967168 }
  0x58   :  { %527 = dma.done.wait [#allocation6], 528  }
  0x59   :  { %528 = vsyncadd [#allocation6], 4294966768 }
  0x5a   :  { %529 = dma.done.wait [#allocation9], 2064  }
  0x5b   :  { %530 = vsyncadd [#allocation9], 4294965232  ;;  %v540_v0 = vmov 0.0|0.0   ;;  %vm541_vm0 = vmmov 0   ;;  %v542_v1 = vmov 0.0   ;;  %v84_v2 = vld [vmem:[#allocation5] sm:$0xff] }
  0x5c   :  { %352 = vmatprep.subr.bf16.mxu0 %v540_v0  ;;  %314 = vmatprep.mubr.msk.f32.mxu0 %vm541_vm0, %v542_v1  ;;  %v85_v3 = vld [vmem:[#allocation5 + $0x8] sm:$0xff]  ;;  %v86_v4 = vld [vmem:[#allocation5 + $0x10] sm:$0xff]  ;;  %v87_v6 = vld [vmem:[#allocation5 + $0x18] sm:$0xff]  ;;  %vm95_vm1 = vcmask 261120   ;;  %s543_s4 = smov [#allocation11]  }
  0x5d   :  { %358 = vmatprep.subr.bf16.mxu1 %v540_v0  ;;  %349 = vmatprep.mubr.msk.f32.mxu1 %vm541_vm0, %v542_v1  ;;  %v353_v5 = vpack.c.bf16 %v85_v3, %v84_v2  ;;  %v170_v7 = vld [vmem:[#allocation8] sm:$0xff]  ;;  %v171_v8 = vld [vmem:[#allocation8 + $0x8] sm:$0xff]  ;;  %v172_v9 = vld [vmem:[#allocation8 + $0x10] sm:$0xff]  ;;  %v356_v11 = vpack.c.bf16 %v87_v6, %v86_v4  ;;  %s270_s27 = sshll.u32 %s543_s4, 4  ;;  %s271_s27 = int_to_ptr.vmem [resolvable:$true] %s270_s27 }
  0x5e   :  { %v173_v10 = vld [vmem:[#allocation8 + $0x18] sm:$0xff]  ;;  %v359_v12 = vpack.c.bf16 %v171_v8, %v170_v7  ;;  %v174_v14 = vld [vmem:[#allocation8 + $0x20] sm:$0xff]  ;;  %v175_v15 = vld [vmem:[#allocation8 + $0x28] sm:$0xff]  ;;  %s503_s3 = scalar_lea.vmem %s271_s27, 128  ;;  %p508_p13 = scmp.lt.s32.totalorder %s271_s27, %s271_s27 }
  0x5f   :  { %354 = vmatpush3.bf16.msra.mxu0 %v353_v5  ;;  %v362_v13 = vpack.c.bf16 %v173_v10, %v172_v9  ;;  %v83_v16 = vld [vmem:[#allocation2] sm:$0xff]  ;;  %v365_v17 = vpack.c.bf16 %v175_v15, %v174_v14  ;;  %v178_v21 = vld [vmem:[#allocation8 + $0x40] sm:$0xff]  ;;  %v179_v22 = vld [vmem:[#allocation8 + $0x48] sm:$0xff]  ;;  %p504_p12 = scmp.ne.s32.totalorder %s271_s27, %s503_s3  ;;  %p509_p0 = scmp.lt.s32.totalorder %s503_s3, %s503_s3 }
  0x60   :  { %355 = vmatprep.subr.bf16.mxu0 %v540_v0  ;;  %360 = vmatpush3.bf16.msra.mxu1 %v359_v12  ;;  %v176_v18 = vld [vmem:[#allocation8 + $0x30] sm:$0xff]  ;;  %v177_v19 = vld [vmem:[#allocation8 + $0x38] sm:$0xff]  ;;  %v371_v23 = vpack.c.bf16 %v179_v22, %v178_v21  ;;  %v182_v27 = vld [vmem:[#allocation8 + $0x60] sm:$0xff] }
  0x61   :  { %361 = vmatprep.subr.bf16.mxu1 %v540_v0  ;;  %v368_v20 = vpack.c.bf16 %v177_v19, %v176_v18  ;;  %v180_v24 = vld [vmem:[#allocation8 + $0x50] sm:$0xff]  ;;  %v181_v25 = vld [vmem:[#allocation8 + $0x58] sm:$0xff]  ;;  %v183_v28 = vld [vmem:[#allocation8 + $0x68] sm:$0xff]  ;;  %p510_p1 = por %p509_p0, %p508_p13 }
  0x62   :  { %v374_v26 = vpack.c.bf16 %v181_v25, %v180_v24  ;;  %v377_v29 = vpack.c.bf16 %v183_v28, %v182_v27  ;;  %v184_v30 = vld [vmem:[#allocation8 + $0x70] sm:$0xff]  ;;  %v185_v31 = vld [vmem:[#allocation8 + $0x78] sm:$0xff]  ;;  %v283_v38 = vld [vmem:[#allocation10] ss:$0 sm:$0xff] }
  0x63   :  { %357 = vmatpush3.bf16.msra.mxu0 %v356_v11  ;;  %v380_v32 = vpack.c.bf16 %v185_v31, %v184_v30  ;;  %v281_v33 = vld [vmem:[#allocation7] ss:$0 sm:$0xff]  ;;  %p511_p2 = pnand %p510_p1, %p504_p12 }
  0x64   :  { %363 = vmatpush3.bf16.msra.mxu1 %v362_v13 }
  0x65   :  { %364 = vmatprep.subr.bf16.mxu1 %v540_v0 }
  0x66   :  { %315 = vmatmul.mubr.msk.f32.vlgmr.msra.gmra.mrb[0].mxu0 %vm95_vm1, %v83_v16 }
  0x68   :  { %366 = vmatpush3.bf16.msra.mxu1 %v365_v17 }
  0x69   :  { %367 = vmatprep.subr.bf16.mxu1 %v540_v0 }
  0x6c   :  { %369 = vmatpush3.bf16.msra.mxu1 %v368_v20 }
  0x6d   :  { %370 = vmatprep.subr.bf16.mxu1 %v540_v0 }
  0x70   :  { %372 = vmatpush3.bf16.msra.mxu1 %v371_v23 }
  0x71   :  { %373 = vmatprep.subr.bf16.mxu1 %v540_v0 }
  0x74   :  { %375 = vmatpush3.bf16.msra.mxu1 %v374_v26 }
  0x75   :  { %376 = vmatprep.subr.bf16.mxu1 %v540_v0 }
  0x78   :  { %378 = vmatpush3.bf16.msra.mxu1 %v377_v29 }
  0x79   :  { %379 = vmatprep.subr.bf16.mxu1 %v540_v0 }
  0x7c   :  { %381 = vmatpush3.bf16.msra.mxu1 %v380_v32 }
 0x139   :  { %v165_v34 = vpop.f32.mrb[0].mxu0 }
 0x13a   :  { %v166_v35 = vadd.f32 %v281_v33, %v165_v34  ;;  %v316_v36 = vpop.f32.mrb[1].mxu0 }
 0x13c   :  { %v169_v37 = vmax.f32 %v166_v35, 0.0 }
 0x13e   :  { %350 = vmatmul.mubr.f32.vlgmr.msra.gmra.mrb[0].mxu1 %v169_v37 }
 0x211   :  { %v259_v39 = vpop.f32.mrb[0].mxu1 }
 0x212   :  { %v260_v40 = vadd.f32 %v283_v38, %v259_v39  ;;  %v351_v41 = vpop.f32.mrb[1].mxu1 }
 0x214   :  { %263 = vst [vmem:[#allocation11] sm:$0xff] %v260_v40 }
 0x215   :  { %514 = shalt.err (!%p511_p2)
}
 0x216   :  { %s515_s30 = scalar_lea.hbm %s651_s5, 128 }
 0x217   :  { %p516_p3 = scmp.ne.s32.totalorder %s651_s5, %s515_s30  ;;  %p519_p4 = scmp.lt.u32.totalorder %s515_s30, %s651_s5 }
 0x219   :  { %p521_p5 = pnand %p519_p4, %p516_p3 }
 0x21b   :  { %524 = shalt.err (!%p521_p5)
}
 0x21c   :  { %273 = dma.vmem_to_hbm [thread:$0]  %s271_s27, 128, %s651_s5, [#allocation4]  }
 0x21d   :  { %531 = dma.done.wait [#allocation4], 128  }
 0x21e   :  { %532 = vsyncadd [#allocation4], 4294967168 }
 0x21f   :  { %277 = vsyncpa [#allocation3], 1 }
 0x220   :  { %278 = vsyncpa [#allocation6], 1 }
 0x221   :  { %279 = vsyncpa [#allocation9], 1 }
 0x222   :  { %280 = vsyncpa [#allocation4], 1 }

</bundles_post_ra>
